<compile_context>
chip_gen: v7x
topology: tpu7x:2x2x1
jax: 0.10.0
libtpu: 0.0.40
codegen_flags: <defaults>
</compile_context>

<pallas_src>
import functools
import numpy as np
import jax
import jax.numpy as jnp
from jax.experimental import pallas as pl
from jax.experimental.pallas import tpu as pltpu


# ---------------------------------------------------------------------------
# Pallas kernels
# ---------------------------------------------------------------------------
def _conv_stats_kernel(s2d_ref, w_ref, b_ref, y_ref, st_ref, *, bn, th, Wo, C4):
    """DownBlock pass 1.

    4x4 stride-2 pad-1 conv expressed as a 2x2 stride-1 conv over the space-to-depth input:
    for each of the 4 taps, a (bn*th*Wo, 4*Cin) x (4*Cin, cout) bf16 MXU matmul with f32
    accumulation.  Per-channel sum / sum-of-squares (BatchNorm training statistics) are
    accumulated into a per-image-group grid-resident block (init on row-tile 0), so the outer
    image-group axis can stay "parallel" (v7x megacore) without racing the accumulator.

    s2d: (bn, Hs, Ws, 4*Cin) bf16 block (bn images, resident across the row-tile axis)
    w  : (16*Cin, cout) bf16 (resident), b: (1, cout) f32 (resident)
    y  : (bn, th*Wo, cout) bf16 tile, st: (1, 2, cout) f32 (row 0 = sum, row 1 = sum of sq.)
    """
    i = pl.program_id(1)

    @pl.when(i == 0)
    def _():
        st_ref[...] = jnp.zeros_like(st_ref)

    r0 = i * th
    acc = None
    for t, (a, b) in enumerate(((0, 0), (0, 1), (1, 0), (1, 1))):
        win = s2d_ref[:, pl.ds(r0 + a, th), b:b + Wo, :]          # (bn, th, Wo, 4*Cin) bf16
        win2 = win.reshape(bn * th * Wo, C4)
        part = jnp.dot(win2, w_ref[t * C4:(t + 1) * C4, :],
                       preferred_element_type=jnp.float32)
        acc = part if acc is None else acc + part
    y = acc + b_ref[...]                                          # (bn*th*Wo, cout) f32
    st_ref[0, 0:1, :] += jnp.sum(y, axis=0, keepdims=True)
    st_ref[0, 1:2, :] += jnp.sum(y * y, axis=0, keepdims=True)
    # bf16 intermediate: the y write + pass-2 re-read dominate HBM traffic on early blocks.
    y_ref[...] = y.reshape(y_ref.shape).astype(y_ref.dtype)
    # TODO(synk): BatchNorm running_mean/running_var updates are a training-only side effect
    # with no influence on the forward output; not materialized here.
    # TODO(synk): the +1-offset tap slices relayout on the sublane path; a pltpu.roll-based
    # variant (XLU slot, idle under MXU-bound code) or one concatenated K=16*Cin matmul would
    # remove that copy.
    # TODO(synk): on v5e, K-tile the resident weight block (Cin=512 -> 8 MiB bf16) with an f32
    # accumulator scratch to stay under the smaller scoped-VMEM limit.


def _bn_lrelu_kernel(y_ref, scale_ref, shift_ref, o_ref):
    """DownBlock pass 2 on the lane-dense (rows, Wo*cout) view: y*scale + shift, LeakyReLU(0.2).

    scale = gamma * rsqrt(var + eps), shift = beta - mean * scale, both pre-tiled along the
    Wo*cout lane axis in XLA glue so the block's last dim is a full, unmasked lane-dense store.
    """
    z = y_ref[...].astype(jnp.float32) * scale_ref[...] + shift_ref[...]
    o_ref[...] = jnp.where(z >= 0.0, z, 0.2 * z).astype(o_ref.dtype)


def _cls_cond_kernel(p_ref, w_ref, c_ref, tab_ref, pw_ref, pb_ref, o_ref, *, inv_sqrt):
    """Fused head: cls conv (im2col matmul, bias=False) + conditioning path + final reduction.

    The cls conv is ONE batched (B*P, 16*c_end) x (16*c_end, cmap_dim) MXU matmul (fills M);
    the conditioning path (argmax -> Embedding -> Linear -> LeakyReLU) uses plain 2-D matmuls
    on non-transposed parameters; the (cls * cmap).sum(channel) is a tiny per-image epilogue.

    p: (B, P, 16*c_end) bf16   w: (16*c_end, cmap_dim) bf16
    c: (B, c_dim) f32   tab: (c_dim, E)   pw: (E, cmap_dim)   pb: (1, cmap_dim)
    o: (B, P, 1) f32
    """
    c = c_ref[...]                                                # (B, c_dim)
    c_dim = c.shape[1]
    mx = jnp.max(c, axis=1, keepdims=True)                        # (B, 1)
    cols = jax.lax.broadcasted_iota(jnp.int32, c.shape, 1)
    # first-max index == torch.argmax tie-break
    idx = jnp.min(jnp.where(c == mx, cols, jnp.int32(c_dim)), axis=1, keepdims=True)
    onehot = (cols == idx).astype(jnp.float32)                    # (B, c_dim)
    emb = jnp.dot(onehot, tab_ref[...], preferred_element_type=jnp.float32)        # (B, E)
    cmap = jnp.dot(emb, pw_ref[...], preferred_element_type=jnp.float32) + pb_ref[...]
    cmap = jnp.where(cmap >= 0.0, cmap, 0.2 * cmap)               # (B, cmap_dim)

    B, P, K = p_ref.shape
    flat = p_ref[...].reshape(B * P, K)
    cls = jnp.dot(flat, w_ref[...], preferred_element_type=jnp.float32)            # (B*P, cmap_dim)
    for b in range(B):                                            # B small, static epilogue
        seg = cls[b * P:(b + 1) * P, :]                           # (P, cmap_dim)
        o_ref[b] = jnp.sum(seg * cmap[b:b + 1, :], axis=-1, keepdims=True) * inv_sqrt


def _vmem_specs(n):
    return [pl.BlockSpec(memory_space=pltpu.MemorySpace.VMEM) for _ in range(n)]


# ---------------------------------------------------------------------------
# JAX glue: layout transforms, parameter setup, tile sizing, drivers
# ---------------------------------------------------------------------------
def _vmem_budget():
    """Scoped-VMEM budget derived from the actual part (~0.75x capacity)."""
    cap = None
    try:
        cap = int(pltpu.get_tpu_info().vmem_capacity_bytes)
    except Exception:
        cap = None
    if not cap or cap <= 0:
        cap = 64 * 1024 * 1024
    return int(cap * 3 // 4)


def _space_to_depth(x):
    """(N, H, W, C) -> pad 1 each side, 2x2 space-to-depth -> (N, H/2+1, W/2+1, 4C).

    Per-cell channel order is (dh, dw, c). One cheap relayout pass instead of a 4x im2col."""
    N, H, W, C = x.shape
    xp = jnp.pad(x, ((0, 0), (1, 1), (1, 1), (0, 0)))
    Hs, Ws = (H + 2) // 2, (W + 2) // 2
    return xp.reshape(N, Hs, 2, Ws, 2, C).transpose(0, 1, 3, 2, 4, 5).reshape(N, Hs, Ws, 4 * C)
    # TODO(synk): fuse this relayout into the previous block's BN/LeakyReLU pass-2 stores to
    # remove one full bf16 activation read+write per layer.


def _rearrange_down_weight(w):
    """HWIO (4,4,Cin,Cout) -> (16*Cin, Cout) with rows ordered (tap=(a,b), dh, dw, cin),
    kh = 2a+dh, kw = 2b+dw, matching the space-to-depth tap decomposition."""
    _, _, cin, cout = w.shape
    w6 = w.reshape(2, 2, 2, 2, cin, cout)          # (a, dh, b, dw, cin, cout)
    w6 = w6.transpose(0, 2, 1, 3, 4, 5)            # (a, b, dh, dw, cin, cout)
    return w6.reshape(16 * cin, cout)


def _im2col(x, k, stride, pad):
    """x: (N, H, W, C) -> (N, Ho*Wo, k*k*C), per-position order (kh, kw, c). Used only for the
    tiny cls conv (P = 5x5); the DownBlock convs never materialize patches."""
    N, H, W, C = x.shape
    if pad:
        x = jnp.pad(x, ((0, 0), (pad, pad), (pad, pad), (0, 0)))
    Ho = (H + 2 * pad - k) // stride + 1
    Wo = (W + 2 * pad - k) // stride + 1
    cols = []
    for kh in range(k):
        for kw in range(k):
            cols.append(x[:, kh:kh + stride * Ho:stride, kw:kw + stride * Wo:stride, :])
    patches = jnp.stack(cols, axis=3)                             # (N, Ho, Wo, k*k, C)
    return patches.reshape(N, Ho * Wo, k * k * C), Ho, Wo


def _spectral_normalize(w2d, iters=30):
    """Deterministic power iteration; spectral_norm() folded into weight setup."""
    u = jnp.ones((w2d.shape[1],), jnp.float32) / np.sqrt(w2d.shape[1])
    v = w2d @ u
    for _ in range(iters):
        v = w2d @ u
        v = v / (jnp.linalg.norm(v) + 1e-12)
        u = w2d.T @ v
        u = u / (jnp.linalg.norm(u) + 1e-12)
    sigma = jnp.dot(v, w2d @ u)
    return w2d / sigma


def _pick_th(Ho, Wo, C4, cout, cap_bytes):
    """Largest row-tile th dividing Ho with (th*Wo) % 8 == 0 (or th == Ho) whose in-kernel
    f32 working set stays under cap_bytes.  th == Ho trivially satisfies the (8,128) rule."""
    valid = [d for d in range(1, Ho + 1)
             if Ho % d == 0 and (d == Ho or (d * Wo) % 8 == 0)]
    best = valid[0]
    for d in valid:
        if d * Wo * (C4 + 2 * cout) * 4 <= cap_bytes:
            best = max(best, d)
    return best


def _pick_bn(N, rows_per_img, s2d_img_bytes, budget_bytes, target_rows=256):
    """Images per grid step: fold batch into the matmul M dim for small-spatial deep blocks
    (fills the 128/256-tall MXU) while keeping the double-buffered s2d block under budget."""
    best = 1
    for bn in range(1, N + 1):
        if N % bn:
            continue
        if bn > 1 and bn * s2d_img_bytes * 2 > budget_bytes:
            break
        best = bn
        if bn * rows_per_img >= target_rows:
            break
    return best


def _pick_row_tile(total_rows, lane_width, elt_bytes, cap_bytes):
    """Largest divisor of total_rows (multiple of 8 or full) whose tile stays under cap_bytes;
    sized by bytes so each pass-2 grid step moves a few MiB (amortizes per-step overhead)."""
    valid = [d for d in range(1, total_rows + 1)
             if total_rows % d == 0 and (d == total_rows or d % 8 == 0)]
    best = valid[0]
    for d in valid:
        if d * lane_width * elt_bytes <= cap_bytes:
            best = max(best, d)
    return best


def init_params(key, *, start_sz, end_sz, ndf, nc, c_dim, cmap_dim, embedding_dim):
    channel_dict = {4: 512, 8: 512, 16: 256, 32: 128, 64: 64, 128: 64,
                    256: 32, 512: 16, 1024: 8}
    if start_sz not in channel_dict:
        sizes = np.array(list(channel_dict.keys()))
        start_sz = int(sizes[np.argmin(np.abs(sizes - start_sz))])
    nfc = dict(channel_dict) if ndf is None else {k: ndf for k in channel_dict}
    if nc is not None:
        nfc[start_sz] = nc

    keys = jax.random.split(key, 64)
    ki = 0
    params = {"blocks": []}
    sz = start_sz
    while sz > end_sz:
        cin, cout = nfc[sz], nfc[sz // 2]
        w = jax.random.normal(keys[ki], (4, 4, cin, cout), jnp.float32) / np.sqrt(16 * cin); ki += 1
        w = _spectral_normalize(w.reshape(16 * cin, cout)).reshape(4, 4, cin, cout)
        w_s2d = _rearrange_down_weight(w).astype(jnp.bfloat16)    # bf16 MXU feed
        b = (jax.random.normal(keys[ki], (cout,), jnp.float32) * 0.01).reshape(1, cout); ki += 1
        params["blocks"].append((w_s2d, b,
                                 jnp.ones((cout,), jnp.float32),
                                 jnp.zeros((cout,), jnp.float32)))
        sz //= 2

    c_end = nfc[end_sz]
    w_cls = jax.random.normal(keys[ki], (4, 4, c_end, cmap_dim), jnp.float32) / np.sqrt(16 * c_end); ki += 1
    w_cls = _spectral_normalize(w_cls.reshape(16 * c_end, cmap_dim))
    params["cls_w"] = w_cls.astype(jnp.bfloat16)                  # (16*c_end, cmap_dim)
    embed = jax.random.normal(keys[ki], (c_dim, embedding_dim), jnp.float32); ki += 1
    proj_w = jax.random.normal(keys[ki], (embedding_dim, cmap_dim), jnp.float32) / np.sqrt(embedding_dim); ki += 1
    proj_b = jax.random.normal(keys[ki], (cmap_dim,), jnp.float32) * 0.01; ki += 1
    params["embed"] = embed                                       # (c_dim, E)
    params["proj_w"] = proj_w                                     # (E, cmap_dim)
    params["proj_b"] = proj_b.reshape(1, cmap_dim)                # (1, cmap_dim)
    params["cmap_dim"] = cmap_dim
    return params


def _down_block(x_bf16, w_s2d, bias, gamma, beta, *, vmem_limit):
    """DownBlock: spectral_norm Conv2d(4,2,1) + BatchNorm2d(train) + LeakyReLU(0.2)."""
    N, H, W, Cin = x_bf16.shape
    cout = w_s2d.shape[1]
    Ho, Wo = H // 2, W // 2
    C4 = 4 * Cin
    M = N * Ho * Wo
    Lc = Wo * cout

    s2d = _space_to_depth(x_bf16)                                 # (N, Hs, Ws, 4*Cin) bf16
    Hs, Ws = s2d.shape[1], s2d.shape[2]

    th = _pick_th(Ho, Wo, C4, cout, vmem_limit // 6)
    HT = Ho // th
    s2d_img_bytes = Hs * Ws * C4 * 2
    bn = _pick_bn(N, Ho * Wo, s2d_img_bytes, vmem_limit // 3)
    NG = N // bn
    # TODO(synk): for very large spatial inputs (v7x 64 MiB VMEM) where the double-buffered
    # whole-image s2d block dominates the budget, switch the s2d input to memory_space=pl.ANY
    # with a manual halo-row strip DMA per row tile.

    kernel = functools.partial(_conv_stats_kernel, bn=bn, th=th, Wo=Wo, C4=C4)
    y, stats = pl.pallas_call(
        kernel,
        out_shape=(jax.ShapeDtypeStruct((N, Ho * Wo, cout), jnp.bfloat16),
                   jax.ShapeDtypeStruct((NG, 2, cout), jnp.float32)),
        grid_spec=pltpu.PrefetchScalarGridSpec(
            num_scalar_prefetch=0,
            grid=(NG, HT),
            in_specs=[
                # bn images' s2d block, resident across the (inner) row-tile axis
                pl.BlockSpec((bn, Hs, Ws, C4), lambda g, i: (g, 0, 0, 0)),
                # weight / bias resident across the whole grid (constant index map)
                pl.BlockSpec((16 * Cin, cout), lambda g, i: (0, 0)),
                pl.BlockSpec((1, cout), lambda g, i: (0, 0)),
            ],
            out_specs=[
                pl.BlockSpec((bn, th * Wo, cout), lambda g, i: (g, i, 0)),
                # per-image-group stats accumulator (resident across the inner axis only)
                pl.BlockSpec((1, 2, cout), lambda g, i: (g, 0, 0)),
            ]),
        compiler_params=pltpu.CompilerParams(
            # image-group axis is independent (per-group stats) -> "parallel" for v7x megacore;
            # row-tile axis carries the stats reduction -> "arbitrary".
            dimension_semantics=("parallel", "arbitrary"),
            vmem_limit_bytes=vmem_limit),
        cost_estimate=pl.CostEstimate(
            flops=2 * M * (16 * Cin) * cout,
            transcendentals=0,
            bytes_accessed=s2d.size * 2 + w_s2d.size * 2 + M * cout * 2),
    )(s2d, w_s2d, bias)

    # Tiny per-channel BN algebra in XLA (O(cout) work): fold into scale/shift for pass 2.
    sums = jnp.sum(stats, axis=0)                                 # (2, cout)
    mean = sums[0] / M
    var = jnp.maximum(sums[1] / M - mean * mean, 0.0)
    # NOTE: single-pass E[y^2]-mean^2 kept in f32; safe for these activation magnitudes.
    inv = jax.lax.rsqrt(var + 1e-5)
    scale_c = gamma * inv
    shift_c = beta - mean * scale_c
    # Lane-dense pass 2: per-channel affine tiled along the Wo*cout lane axis.
    scale = jnp.tile(scale_c, Wo).reshape(1, Lc).astype(jnp.float32)
    shift = jnp.tile(shift_c, Wo).reshape(1, Lc).astype(jnp.float32)

    rows = N * Ho
    y2 = y.reshape(rows, Lc)                                      # free row-major relabel
    tm = _pick_row_tile(rows, Lc, 2, vmem_limit // 8)
    out = pl.pallas_call(
        _bn_lrelu_kernel,
        out_shape=jax.ShapeDtypeStruct((rows, Lc), jnp.bfloat16),
        grid_spec=pltpu.PrefetchScalarGridSpec(
            num_scalar_prefetch=0,
            grid=(rows // tm,),
            in_specs=[pl.BlockSpec((tm, Lc), lambda r: (r, 0)),
                      pl.BlockSpec((1, Lc), lambda r: (0, 0)),
                      pl.BlockSpec((1, Lc), lambda r: (0, 0))],
            out_specs=pl.BlockSpec((tm, Lc), lambda r: (r, 0))),
        compiler_params=pltpu.CompilerParams(
            dimension_semantics=("parallel",),                    # megacore-shardable on v7x
            vmem_limit_bytes=vmem_limit),
    )(y2, scale, shift)
    return out.reshape(N, Ho, Wo, cout)


def single_disc_cond_forward(params, x_nchw, c):
    """Matches SingleDiscCond.forward(x, c): x NCHW, c (B, c_dim) -> (B, 1, Ho, Wo)."""
    vmem_limit = _vmem_budget()                                   # ~0.75x physical VMEM per part
    x = jnp.transpose(x_nchw, (0, 2, 3, 1)).astype(jnp.bfloat16)  # NHWC, bf16 MXU feed

    # self.main: chain of DownBlocks (each = two tiled pallas_calls).
    for (w_s2d, bias, gamma, beta) in params["blocks"]:
        x = _down_block(x, w_s2d, bias, gamma, beta, vmem_limit=vmem_limit)

    # self.cls + self.embed/embed_proj + weighted channel reduction, fused into one pallas_call.
    N = x.shape[0]
    patches, Hc, Wc = _im2col(x, k=4, stride=1, pad=0)            # (N, 25, 16*c_end) bf16, tiny
    P = Hc * Wc
    cmap_dim = params["cmap_dim"]

    out3 = pl.pallas_call(
        functools.partial(_cls_cond_kernel, inv_sqrt=float(1.0 / np.sqrt(cmap_dim))),
        out_shape=jax.ShapeDtypeStruct((N, P, 1), jnp.float32),
        in_specs=_vmem_specs(6),
        out_specs=pl.BlockSpec(memory_space=pltpu.MemorySpace.VMEM),
        compiler_params=pltpu.CompilerParams(vmem_limit_bytes=vmem_limit),
    )(patches, params["cls_w"], c.astype(jnp.float32),
      params["embed"], params["proj_w"], params["proj_b"])

    return out3.reshape(N, 1, Hc, Wc)


if __name__ == "__main__":
    key = jax.random.PRNGKey(0)
    kp, kx, kc = jax.random.split(key, 3)

    # Small configuration: start_sz=16, end_sz=8 -> one DownBlock; ndf=16 channels;
    # label space c_dim=10; default cmap_dim=64, embedding_dim=128.
    B, start_sz, end_sz, ndf = 2, 16, 8, 16
    c_dim, cmap_dim, embedding_dim = 10, 64, 128

    params = init_params(kp, start_sz=start_sz, end_sz=end_sz, ndf=ndf, nc=None,
                         c_dim=c_dim, cmap_dim=cmap_dim, embedding_dim=embedding_dim)

    # PyTorch-style NCHW input: (B, nfc[start_sz], start_sz, start_sz)
    x = jax.random.normal(kx, (B, ndf, start_sz, start_sz), jnp.float32)
    c = jax.random.normal(kc, (B, c_dim), jnp.float32)

    out = single_disc_cond_forward(params, x, c)
    out = jax.block_until_ready(out)
    assert out.shape == (B, 1, 5, 5), out.shape
    print("KERNEL_OK")
</pallas_src>

<mosaic_0001>
module attributes {stable_mosaic.version = 11 : i64} {
  func.func @_conv_stats_kernel(%arg0: i32, %arg1: i32, %arg2: memref<2x9x9x64xbf16, #tpu.memory_space<vmem>>, %arg3: memref<256x16xbf16, #tpu.memory_space<vmem>>, %arg4: memref<1x16xf32, #tpu.memory_space<vmem>>, %arg5: memref<2x64x16xbf16, #tpu.memory_space<vmem>>, %arg6: memref<1x2x16xf32, #tpu.memory_space<vmem>>) attributes {dimension_semantics = [#tpu.dimension_semantics<parallel>, #tpu.dimension_semantics<arbitrary>], iteration_bounds = array<i64: 1, 1>, scalar_prefetch = 0 : i64, scratch_operands = 0 : i64, tpu.core_type = #tpu.core_type<tc>, window_params = [{transform_indices = @transform_0, window_bounds = array<i64: 2, 9, 9, 64>}, {pipeline_mode = #tpu.pipeline_mode<synchronous>, transform_indices = @transform_1, window_bounds = array<i64: 256, 16>}, {pipeline_mode = #tpu.pipeline_mode<synchronous>, transform_indices = @transform_2, window_bounds = array<i64: 1, 16>}, {transform_indices = @transform_3, window_bounds = array<i64: 2, 64, 16>}, {transform_indices = @transform_4, window_bounds = array<i64: 1, 2, 16>}]} {
    %c0_i32 = arith.constant 0 : i32
    %0 = arith.cmpi eq, %arg1, %c0_i32 : i32
    %1 = arith.extui %0 : i1 to i32
    %c0_i32_0 = arith.constant 0 : i32
    %2 = arith.cmpi ne, %1, %c0_i32_0 : i32
    scf.if %2 {
      %cst_41 = arith.constant 0.000000e+00 : f32
      %54 = vector.broadcast %cst_41 : f32 to vector<1x2x16xf32>
      %c0_42 = arith.constant 0 : index
      %c0_43 = arith.constant 0 : index
      %c0_44 = arith.constant 0 : index
      %55 = vector.load %arg6[%c0_42, %c0_43, %c0_44] : memref<1x2x16xf32, #tpu.memory_space<vmem>>, vector<1x2x16xf32>
      tpu.vector_store %arg6[%c0_42, %c0_43, %c0_44], %54 {strides = array<i32>} : memref<1x2x16xf32, #tpu.memory_space<vmem>>, vector<1x2x16xf32>,
    } else {
    }
    %c8_i32 = arith.constant 8 : i32
    %3 = arith.muli %arg1, %c8_i32 : i32
    %c0_i32_1 = arith.constant 0 : i32
    %4 = arith.addi %3, %c0_i32_1 : i32
    %c0 = arith.constant 0 : index
    %5 = arith.index_cast %4 : i32 to index
    %c0_2 = arith.constant 0 : index
    %c0_3 = arith.constant 0 : index
    %6 = vector.load %arg2[%c0, %5, %c0_2, %c0_3] : memref<2x9x9x64xbf16, #tpu.memory_space<vmem>>, vector<2x8x8x64xbf16>
    %7 = vector.shape_cast %6 : vector<2x8x8x64xbf16> to vector<128x64xbf16>
    %c0_4 = arith.constant 0 : index
    %c0_5 = arith.constant 0 : index
    %8 = vector.load %arg3[%c0_4, %c0_5] : memref<256x16xbf16, #tpu.memory_space<vmem>>, vector<64x16xbf16>
    %cst = arith.constant dense<0.000000e+00> : vector<128x16xf32>
    %9 = tpu.matmul %7, %8, %cst {dimension_numbers = #tpu.dot_dimension_numbers<[1], [0], [0], [1], [0, 0, 1, 1], [], []>} : vector<128x64xbf16>, vector<64x16xbf16>, vector<128x16xf32> -> vector<128x16xf32>
    %c0_i32_6 = arith.constant 0 : i32
    %10 = arith.addi %3, %c0_i32_6 : i32
    %c0_7 = arith.constant 0 : index
    %11 = arith.index_cast %10 : i32 to index
    %c1 = arith.constant 1 : index
    %c0_8 = arith.constant 0 : index
    %12 = vector.load %arg2[%c0_7, %11, %c1, %c0_8] : memref<2x9x9x64xbf16, #tpu.memory_space<vmem>>, vector<2x8x8x64xbf16>
    %13 = vector.shape_cast %12 : vector<2x8x8x64xbf16> to vector<128x64xbf16>
    %c64 = arith.constant 64 : index
    %c0_9 = arith.constant 0 : index
    %14 = vector.load %arg3[%c64, %c0_9] : memref<256x16xbf16, #tpu.memory_space<vmem>>, vector<64x16xbf16>
    %cst_10 = arith.constant dense<0.000000e+00> : vector<128x16xf32>
    %15 = tpu.matmul %13, %14, %cst_10 {dimension_numbers = #tpu.dot_dimension_numbers<[1], [0], [0], [1], [0, 0, 1, 1], [], []>} : vector<128x64xbf16>, vector<64x16xbf16>, vector<128x16xf32> -> vector<128x16xf32>
    %16 = arith.addf %9, %15 : vector<128x16xf32>
    %c1_i32 = arith.constant 1 : i32
    %17 = arith.addi %3, %c1_i32 : i32
    %c0_11 = arith.constant 0 : index
    %18 = arith.index_cast %17 : i32 to index
    %c0_12 = arith.constant 0 : index
    %c0_13 = arith.constant 0 : index
    %19 = vector.load %arg2[%c0_11, %18, %c0_12, %c0_13] : memref<2x9x9x64xbf16, #tpu.memory_space<vmem>>, vector<2x8x8x64xbf16>
    %20 = vector.shape_cast %19 : vector<2x8x8x64xbf16> to vector<128x64xbf16>
    %c128 = arith.constant 128 : index
    %c0_14 = arith.constant 0 : index
    %21 = vector.load %arg3[%c128, %c0_14] : memref<256x16xbf16, #tpu.memory_space<vmem>>, vector<64x16xbf16>
    %cst_15 = arith.constant dense<0.000000e+00> : vector<128x16xf32>
    %22 = tpu.matmul %20, %21, %cst_15 {dimension_numbers = #tpu.dot_dimension_numbers<[1], [0], [0], [1], [0, 0, 1, 1], [], []>} : vector<128x64xbf16>, vector<64x16xbf16>, vector<128x16xf32> -> vector<128x16xf32>
    %23 = arith.addf %16, %22 : vector<128x16xf32>
    %c1_i32_16 = arith.constant 1 : i32
    %24 = arith.addi %3, %c1_i32_16 : i32
    %c0_17 = arith.constant 0 : index
    %25 = arith.index_cast %24 : i32 to index
    %c1_18 = arith.constant 1 : index
    %c0_19 = arith.constant 0 : index
    %26 = vector.load %arg2[%c0_17, %25, %c1_18, %c0_19] : memref<2x9x9x64xbf16, #tpu.memory_space<vmem>>, vector<2x8x8x64xbf16>
    %27 = vector.shape_cast %26 : vector<2x8x8x64xbf16> to vector<128x64xbf16>
    %c192 = arith.constant 192 : index
    %c0_20 = arith.constant 0 : index
    %28 = vector.load %arg3[%c192, %c0_20] : memref<256x16xbf16, #tpu.memory_space<vmem>>, vector<64x16xbf16>
    %cst_21 = arith.constant dense<0.000000e+00> : vector<128x16xf32>
    %29 = tpu.matmul %27, %28, %cst_21 {dimension_numbers = #tpu.dot_dimension_numbers<[1], [0], [0], [1], [0, 0, 1, 1], [], []>} : vector<128x64xbf16>, vector<64x16xbf16>, vector<128x16xf32> -> vector<128x16xf32>
    %30 = arith.addf %23, %29 : vector<128x16xf32>
    %c0_22 = arith.constant 0 : index
    %c0_23 = arith.constant 0 : index
    %31 = vector.load %arg4[%c0_22, %c0_23] : memref<1x16xf32, #tpu.memory_space<vmem>>, vector<1x16xf32>
    %32 = vector.broadcast %31 : vector<1x16xf32> to vector<128x16xf32>
    %33 = arith.addf %30, %32 : vector<128x16xf32>
    %c0_24 = arith.constant 0 : index
    %c0_25 = arith.constant 0 : index
    %c0_26 = arith.constant 0 : index
    %34 = vector.load %arg6[%c0_24, %c0_25, %c0_26] : memref<1x2x16xf32, #tpu.memory_space<vmem>>, vector<1x1x16xf32>
    %35 = vector.shape_cast %34 : vector<1x1x16xf32> to vector<1x16xf32>
    %cst_27 = arith.constant dense<0.000000e+00> : vector<16xf32>
    %36 = vector.multi_reduction <add>, %33, %cst_27 [0] : vector<128x16xf32> to vector<16xf32>
    %37 = vector.shape_cast %36 : vector<16xf32> to vector<1x16xf32>
    %38 = arith.addf %35, %37 : vector<1x16xf32>
    %c0_28 = arith.constant 0 : index
    %c0_29 = arith.constant 0 : index
    %c0_30 = arith.constant 0 : index
    %39 = vector.load %arg6[%c0_28, %c0_29, %c0_30] : memref<1x2x16xf32, #tpu.memory_space<vmem>>, vector<1x1x16xf32>
    %40 = vector.shape_cast %39 : vector<1x1x16xf32> to vector<1x16xf32>
    %41 = vector.shape_cast %38 : vector<1x16xf32> to vector<1x1x16xf32>
    tpu.vector_store %arg6[%c0_28, %c0_29, %c0_30], %41 {strides = array<i32>} : memref<1x2x16xf32, #tpu.memory_space<vmem>>, vector<1x1x16xf32>,
    %c0_31 = arith.constant 0 : index
    %c1_32 = arith.constant 1 : index
    %c0_33 = arith.constant 0 : index
    %42 = vector.load %arg6[%c0_31, %c1_32, %c0_33] : memref<1x2x16xf32, #tpu.memory_space<vmem>>, vector<1x1x16xf32>
    %43 = vector.shape_cast %42 : vector<1x1x16xf32> to vector<1x16xf32>
    %44 = arith.mulf %33, %33 : vector<128x16xf32>
    %cst_34 = arith.constant dense<0.000000e+00> : vector<16xf32>
    %45 = vector.multi_reduction <add>, %44, %cst_34 [0] : vector<128x16xf32> to vector<16xf32>
    %46 = vector.shape_cast %45 : vector<16xf32> to vector<1x16xf32>
    %47 = arith.addf %43, %46 : vector<1x16xf32>
    %c0_35 = arith.constant 0 : index
    %c1_36 = arith.constant 1 : index
    %c0_37 = arith.constant 0 : index
    %48 = vector.load %arg6[%c0_35, %c1_36, %c0_37] : memref<1x2x16xf32, #tpu.memory_space<vmem>>, vector<1x1x16xf32>
    %49 = vector.shape_cast %48 : vector<1x1x16xf32> to vector<1x16xf32>
    %50 = vector.shape_cast %47 : vector<1x16xf32> to vector<1x1x16xf32>
    tpu.vector_store %arg6[%c0_35, %c1_36, %c0_37], %50 {strides = array<i32>} : memref<1x2x16xf32, #tpu.memory_space<vmem>>, vector<1x1x16xf32>,
    %51 = vector.shape_cast %33 : vector<128x16xf32> to vector<2x64x16xf32>
    %52 = arith.truncf %51 : vector<2x64x16xf32> to vector<2x64x16xbf16>
    %c0_38 = arith.constant 0 : index
    %c0_39 = arith.constant 0 : index
    %c0_40 = arith.constant 0 : index
    %53 = vector.load %arg5[%c0_38, %c0_39, %c0_40] : memref<2x64x16xbf16, #tpu.memory_space<vmem>>, vector<2x64x16xbf16>
    tpu.vector_store %arg5[%c0_38, %c0_39, %c0_40], %52 {strides = array<i32>} : memref<2x64x16xbf16, #tpu.memory_space<vmem>>, vector<2x64x16xbf16>,
    return
  }
  func.func @transform_0(%arg0: i32, %arg1: i32) -> (i32, i32, i32, i32) {
    %c0_i32 = arith.constant 0 : i32
    %c0_i32_0 = arith.constant 0 : i32
    %c0_i32_1 = arith.constant 0 : i32
    %c0_i32_2 = arith.constant 0 : i32
    return %arg0, %c0_i32, %c0_i32_0, %c0_i32_1 : i32, i32, i32, i32
  }
  func.func @transform_1(%arg0: i32, %arg1: i32) -> (i32, i32) {
    %c0_i32 = arith.constant 0 : i32
    %c0_i32_0 = arith.constant 0 : i32
    %c0_i32_1 = arith.constant 0 : i32
    return %c0_i32, %c0_i32_0 : i32, i32
  }
  func.func @transform_2(%arg0: i32, %arg1: i32) -> (i32, i32) {
    %c0_i32 = arith.constant 0 : i32
    %c0_i32_0 = arith.constant 0 : i32
    %c0_i32_1 = arith.constant 0 : i32
    return %c0_i32, %c0_i32_0 : i32, i32
  }
  func.func @transform_3(%arg0: i32, %arg1: i32) -> (i32, i32, i32) {
    %c0_i32 = arith.constant 0 : i32
    %c0_i32_0 = arith.constant 0 : i32
    return %arg0, %arg1, %c0_i32 : i32, i32, i32
  }
  func.func @transform_4(%arg0: i32, %arg1: i32) -> (i32, i32, i32) {
    %c0_i32 = arith.constant 0 : i32
    %c0_i32_0 = arith.constant 0 : i32
    %c0_i32_1 = arith.constant 0 : i32
    return %arg0, %c0_i32, %c0_i32_0 : i32, i32, i32
  }
}

</mosaic_0001>

<bundles_post_ra>
// kernel: tpu_custom_call.1
= control target key start
LH: loop header
LB: loop body
LE: loop exit
PB: predicated region body
PF: predicated region fallthrough
CT: control target
= control target key end

     0   :  { %vm351_vm0 = vcmask 523264   ;;  %vm68_vm1 = vsmask.f32 3328  ;;  %vm69_vm2 = vsmask.f32 7440  ;;  %s2595_s0 = inlined_call_operand.vmem [shape: bf16[2,9,9,64], index: 0, kind: input, shape index: {}]   ;;  %s2596_s1 = inlined_call_operand.vmem [shape: bf16[256,16], index: 1, kind: input, shape index: {}]   ;;  %s2597_s2 = inlined_call_operand.vmem [shape: f32[1,16], index: 2, kind: input, shape index: {}]   ;;  %s2598_s3 = inlined_call_operand.vmem [shape: bf16[2,64,16], index: 3, kind: output, shape index: {0}]   ;;  %s2599_s4 = inlined_call_operand.hbm [shape: f32[1,2,16], index: 4, kind: output, shape index: {1}]  }
   0x1   :  { %v1912_v0 = vld [vmem:[%s2596_s1 + $0x20] sm:$0xff]   ;;  %v1914_v2 = vld [vmem:[%s2596_s1 + $0x28] sm:$0xff]   ;;  %v1916_v4 = vld [vmem:[%s2596_s1 + $0x30] sm:$0xff]  }
   0x2   :  { %v1913_v1 = vld [vmem:[%s2596_s1 + $0x40] sm:$0xff]   ;;  %1766 = vmatprep.subr.bf16.mxu1 %v1912_v0  ;;  %v1915_v3 = vld [vmem:[%s2596_s1 + $0x48] sm:$0xff]   ;;  %v1917_v5 = vld [vmem:[%s2596_s1 + $0x50] sm:$0xff]  }
   0x3   :  { %1814 = vmatprep.subr.bf16.mxu0 %v1913_v1  ;;  %1767 = vmatpush3.bf16.msra.mxu1 %v1912_v0  ;;  %v1918_v6 = vld [vmem:[%s2596_s1 + $0x38] sm:$0xff]   ;;  %v2022_v8 = vld [vmem:[%s2595_s0] sm:$0xf]  ;;  %v2027_v9 = vld [vmem:[%s2595_s0 + $0x8] sm:$0xf] }
   0x4   :  { %1815 = vmatpush3.bf16.msra.mxu0 %v1913_v1  ;;  %1768 = vmatprep.subr.bf16.mxu1 %v1914_v2  ;;  %v1919_v7 = vld [vmem:[%s2596_s1 + $0x58] sm:$0xff]   ;;  %v52_v10 = vld [vmem:[%s2595_s0 + $0x4] sm:$0x1]  ;;  %v53_v11 = vld [vmem:[%s2595_s0 + $0xc] sm:$0x1]  ;;  %v72_v12 = vshrl.u32 %v2022_v8, 16 }
   0x5   :  { %1816 = vmatprep.subr.bf16.mxu0 %v1915_v3  ;;  %v75_v13 = vshll.u32 %v2022_v8, 16  ;;  %v81_v14 = vshll.u32 %v52_v10, 16  ;;  %v86_v15 = vshrl.u32 %v2027_v9, 16  ;;  %v89_v16 = vshll.u32 %v2027_v9, 16  ;;  %v1920_v18 = vld [vmem:[%s2595_s0 + $0x8] ss:$8 sps:$4 sm:$0xff]   ;;  %vm2068_vm3 = vmor %vm68_vm1, %vm69_vm2 }
   0x6   :  { %v95_v17 = vshll.u32 %v53_v11, 16  ;;  %v74_v19 = vrot.slane %v72_v12, 4  ;;  %v2045_v23 = vld [vmem:[%s2595_s0 + $0x10] sm:$0xf]  ;;  %1822 = vmatprep.mubr.msk.bf16.mxu0 %vm351_vm0, %v1920_v18  ;;  %v2051_v26 = vld [vmem:[%s2595_s0 + $0x18] sm:$0xf] }
   0x7   :  { %1769 = vmatpush3.bf16.msra.mxu1 %v1914_v2  ;;  %v77_v20 = vrot.slane %v75_v13, 5  ;;  %v83_v21 = vrot.slane %v81_v14, 5  ;;  %v88_v22 = vrot.slane %v86_v15, 4  ;;  %v91_v24 = vrot.slane %v89_v16, 5  ;;  %v54_v27 = vld [vmem:[%s2595_s0 + $0x14] sm:$0x1] }
   0x8   :  { %1817 = vmatpush3.bf16.msra.mxu0 %v1915_v3  ;;  %1770 = vmatprep.subr.bf16.mxu1 %v1916_v4  ;;  %v97_v25 = vrot.slane %v95_v17, 5  ;;  %v55_v29 = vld [vmem:[%s2595_s0 + $0x1c] sm:$0x1]  ;;  %v100_v30 = vshrl.u32 %v2045_v23, 16  ;;  %v103_v31 = vshll.u32 %v2045_v23, 16  ;;  %v109_v32 = vshll.u32 %v54_v27, 16 }
   0x9   :  { %1818 = vmatprep.subr.bf16.mxu0 %v1917_v5  ;;  %v78_v28 = vor.u32 %v77_v20, %v74_v19  ;;  %v2064_v33 = vld [vmem:[%s2596_s1] sm:$0xff]   ;;  %v92_v35 = vor.u32 %v91_v24, %v88_v22  ;;  %v114_v36 = vshrl.u32 %v2051_v26, 16  ;;  %v117_v37 = vshll.u32 %v2051_v26, 16  ;;  %v2093_v54 = vld [vmem:[%s2595_s0 + $0x28] sm:$0xf] }
   0xa   :  { %v123_v38 = vshll.u32 %v55_v29, 16  ;;  %v1923_v39 = vld [vmem:[%s2596_s1 + $0x60] sm:$0xff]   ;;  %v102_v41 = vrot.slane %v100_v30, 4  ;;  %v105_v42 = vrot.slane %v103_v31, 5  ;;  %v111_v43 = vrot.slane %v109_v32, 5  ;;  %v1927_v12 = vld [vmem:[%s2596_s1 + $0x68] sm:$0xff]  }
   0xb   :  { %1771 = vmatpush3.bf16.msra.mxu1 %v1916_v4  ;;  %v79_v40 = vrot.slane %v78_v28, 4  ;;  %v93_v44 = vrot.slane %v92_v35, 4  ;;  %v116_v45 = vrot.slane %v114_v36, 4  ;;  %v119_v46 = vrot.slane %v117_v37, 5  ;;  %v1922_v50 = vld [vmem:[%s2595_s0 + $0x18] ss:$8 sps:$4 sm:$0xff]  }
   0xc   :  { %1819 = vmatpush3.bf16.msra.mxu0 %v1917_v5  ;;  %1772 = vmatprep.subr.bf16.mxu1 %v1918_v6  ;;  %v125_v47 = vrot.slane %v123_v38, 5  ;;  %v106_v49 = vor.u32 %v105_v42, %v102_v41  ;;  %v2088_v53 = vld [vmem:[%s2595_s0 + $0x20] sm:$0xf]  ;;  %v56_v57 = vld [vmem:[%s2595_s0 + $0x24] sm:$0x1]  ;;  %v142_v63 = vshrl.u32 %v2093_v54, 16 }
   0xd   :  { %1820 = vmatprep.subr.bf16.mxu0 %v1919_v7  ;;  %v84_v48 = vsel %vm2068_vm3, %v79_v40, %v83_v21  ;;  %v98_v51 = vsel %vm2068_vm3, %v93_v44, %v97_v25  ;;  %v120_v52 = vor.u32 %v119_v46, %v116_v45  ;;  %v57_v58 = vld [vmem:[%s2595_s0 + $0x2c] sm:$0x1]  ;;  %v128_v59 = vshrl.u32 %v2088_v53, 16  ;;  %v1924_v11 = vld [vmem:[%s2595_s0 + $0x28] ss:$8 sps:$4 sm:$0xff]  }
   0xe   :  { %v1557_v55 = vcombine.low %v84_v48, %v98_v51  ;;  %v107_v56 = vrot.slane %v106_v49, 4  ;;  %v131_v61 = vshll.u32 %v2088_v53, 16  ;;  %v137_v62 = vshll.u32 %v56_v57, 16  ;;  %v1925_v4 = vld [vmem:[%s2596_s1 + $0x8] sm:$0xff]   ;;  %v2123_v16 = vld [vmem:[%s2595_s0 + $0x30] sm:$0xf] }
   0xf   :  { %1773 = vmatpush3.bf16.msra.mxu1 %v1918_v6  ;;  %v121_v60 = vrot.slane %v120_v52, 4  ;;  %v130_v1 = vrot.slane %v128_v59, 4  ;;  %v145_v2 = vshll.u32 %v2093_v54, 16  ;;  %v151_v3 = vshll.u32 %v57_v58, 16  ;;  %v2128_v17 = vld [vmem:[%s2595_s0 + $0x38] sm:$0xf] }
  0x10   :  { %1821 = vmatpush3.bf16.msra.mxu0 %v1919_v7  ;;  %1790 = vmatprep.subr.bf16.mxu1 %v2064_v33  ;;  %v112_v0 = vsel %vm2068_vm3, %v107_v56, %v111_v43  ;;  %v133_v6 = vrot.slane %v131_v61, 5  ;;  %v139_v7 = vrot.slane %v137_v62, 5  ;;  %v144_v10 = vrot.slane %v142_v63, 4  ;;  %v58_v19 = vld [vmem:[%s2595_s0 + $0x34] sm:$0x1]  ;;  %v1933_v63 = vld [vmem:[%s2596_s1 + $0x18] sm:$0xff]  }
  0x11   :  { %1838 = vmatprep.subr.bf16.mxu0 %v1923_v39  ;;  %1774 = vmatprep.mubr.msk.bf16.mxu1 %vm351_vm0, %v1557_v55  ;;  %v126_v5 = vsel %vm2068_vm3, %v121_v60, %v125_v47  ;;  %v147_v14 = vrot.slane %v145_v2, 5  ;;  %v153_v15 = vrot.slane %v151_v3, 5  ;;  %v59_v20 = vld [vmem:[%s2595_s0 + $0x3c] sm:$0x1]  ;;  %v156_v21 = vshrl.u32 %v2123_v16, 16  ;;  %v1929_v29 = vld [vmem:[%s2596_s1 + $0x10] sm:$0xff]  }
  0x12   :  { %v1558_v13 = vcombine.low %v112_v0, %v126_v5  ;;  %v134_v18 = vor.u32 %v133_v6, %v130_v1  ;;  %v159_v22 = vshll.u32 %v2123_v16, 16  ;;  %v165_v25 = vshll.u32 %v58_v19, 16  ;;  %v1926_v43 = vld [vmem:[%s2595_s0 + $0x38] ss:$8 sps:$4 sm:$0xff]   ;;  %v2159_v46 = vld [vmem:[%s2595_s0 + $0x48] sm:$0xf] }
  0x13   :  { %1823 = vmatmul.mubr.msk.bf16.vlgmr.msra.gmra.mrb[0].mxu0 %vm351_vm0, %v1922_v50  ;;  %v148_v24 = vor.u32 %v147_v14, %v144_v10  ;;  %v170_v27 = vshrl.u32 %v2128_v17, 16  ;;  %v173_v28 = vshll.u32 %v2128_v17, 16  ;;  %v158_v31 = vrot.slane %v156_v21, 4  ;;  %v2165_v49 = vld [vmem:[%s2595_s0 + $0x50] sm:$0xf] }
  0x14   :  { %1839 = vmatpush3.bf16.msra.mxu0 %v1923_v39  ;;  %1826 = vmatprep.mubr.msk.bf16.mxu0 %vm351_vm0, %v1924_v11  ;;  %v135_v30 = vrot.slane %v134_v18, 4  ;;  %v161_v32 = vrot.slane %v159_v22, 5  ;;  %v179_v35 = vshll.u32 %v59_v20, 16  ;;  %v167_v37 = vrot.slane %v165_v25, 5  ;;  %v60_v50 = vld [vmem:[%s2595_s0 + $0x4c] sm:$0x1] }
  0x15   :  { %1840 = vmatprep.subr.bf16.mxu0 %v1927_v12  ;;  %1775 = vmatmul.mubr.msk.bf16.vlgmr.msra.gmra.mrb[0].mxu1 %vm351_vm0, %v1558_v13  ;;  %v149_v36 = vrot.slane %v148_v24, 4  ;;  %v172_v38 = vrot.slane %v170_v27, 4  ;;  %v175_v39 = vrot.slane %v173_v28, 5  ;;  %v184_v51 = vshrl.u32 %v2159_v46, 16  ;;  %v61_v55 = vld [vmem:[%s2595_s0 + $0x54] sm:$0x1] }
  0x16   :  { %1791 = vmatpush3.bf16.msra.mxu1 %v2064_v33  ;;  %v140_v40 = vsel %vm2068_vm3, %v135_v30, %v139_v7  ;;  %v162_v41 = vor.u32 %v161_v32, %v158_v31  ;;  %v181_v42 = vrot.slane %v179_v35, 5  ;;  %v1931_v33 = vld [vmem:[%s2596_s1 + $0x70] sm:$0xff]   ;;  %v187_v56 = vshll.u32 %v2159_v46, 16  ;;  %v2194_v11 = vld [vmem:[%s2595_s0 + $0x58] sm:$0xf] }
  0x17   :  { %1792 = vmatprep.subr.bf16.mxu1 %v1925_v4  ;;  %v154_v44 = vsel %vm2068_vm3, %v149_v36, %v153_v15  ;;  %v176_v45 = vor.u32 %v175_v39, %v172_v38  ;;  %v193_v57 = vshll.u32 %v60_v50, 16  ;;  %v198_v58 = vshrl.u32 %v2165_v49, 16  ;;  %v1928_v10 = vld [vmem:[%s2595_s0 + $0x50] ss:$8 sps:$4 sm:$0xff]   ;;  %v2199_v13 = vld [vmem:[%s2595_s0 + $0x60] sm:$0xf] }
  0x18   :  { %1841 = vmatpush3.bf16.msra.mxu0 %v1927_v12  ;;  %v1559_v47 = vcombine.low %v140_v40, %v154_v44  ;;  %v163_v48 = vrot.slane %v162_v41, 4  ;;  %v186_v60 = vrot.slane %v184_v51, 4  ;;  %v201_v61 = vshll.u32 %v2165_v49, 16  ;;  %v62_v14 = vld [vmem:[%s2595_s0 + $0x5c] sm:$0x1] }
  0x19   :  { %v177_v52 = vrot.slane %v176_v45, 4  ;;  %1842 = vmatprep.subr.bf16.mxu0 %v1931_v33  ;;  %v207_v62 = vshll.u32 %v61_v55, 16  ;;  %v189_v1 = vrot.slane %v187_v56, 5  ;;  %v195_v2 = vrot.slane %v193_v57, 5  ;;  %v63_v15 = vld [vmem:[%s2595_s0 + $0x64] sm:$0x1] }
  0x1a   :  { %1793 = vmatpush3.bf16.msra.mxu1 %v1925_v4  ;;  %1778 = vmatprep.mubr.msk.bf16.mxu1 %vm351_vm0, %v1559_v47  ;;  %v168_v59 = vsel %vm2068_vm3, %v163_v48, %v167_v37  ;;  %v200_v3 = vrot.slane %v198_v58, 4  ;;  %v1935_v4 = vld [vmem:[%s2596_s1 + $0x78] sm:$0xff]   ;;  %v203_v6 = vrot.slane %v201_v61, 5  ;;  %v212_v19 = vshrl.u32 %v2194_v11, 16  ;;  %v1930_v40 = vld [vmem:[%s2595_s0 + $0x60] ss:$8 sps:$4 sm:$0xff]  }
  0x1b   :  { %1827 = vmatmul.mubr.msk.bf16.gmra.mrb[4].mxu0 %vm351_vm0, %v1926_v43  ;;  %1794 = vmatprep.subr.bf16.mxu1 %v1929_v29  ;;  %v182_v0 = vsel %vm2068_vm3, %v177_v52, %v181_v42  ;;  %v209_v7 = vrot.slane %v207_v62, 5  ;;  %v190_v12 = vor.u32 %v189_v1, %v186_v60  ;;  %v215_v20 = vshll.u32 %v2194_v11, 16  ;;  %v2223_v43 = vld [vmem:[%s2595_s0 + $0x68] sm:$0xf]  ;;  %v64_v44 = vld [vmem:[%s2595_s0 + $0x6c] sm:$0x1] }
  0x1c   :  { %1843 = vmatpush3.bf16.msra.mxu0 %v1931_v33  ;;  %v1560_v5 = vcombine.low %v168_v59, %v182_v0  ;;  %v204_v18 = vor.u32 %v203_v6, %v200_v3  ;;  %1830 = vmatprep.mubr.msk.bf16.mxu0 %vm351_vm0, %v1928_v10  ;;  %v221_v21 = vshll.u32 %v62_v14, 16  ;;  %v226_v24 = vshrl.u32 %v2199_v13, 16  ;;  %v2228_v33 = vld [vmem:[%s2595_s0 + $0x70] sm:$0xf]  ;;  %v65_v47 = vld [vmem:[%s2595_s0 + $0x74] sm:$0x1] }
  0x1d   :  { %1844 = vmatprep.subr.bf16.mxu0 %v1935_v4  ;;  %v191_v22 = vrot.slane %v190_v12, 4  ;;  %v229_v25 = vshll.u32 %v2199_v13, 16  ;;  %v235_v27 = vshll.u32 %v63_v15, 16  ;;  %v217_v30 = vrot.slane %v215_v20, 5  ;;  %v2257_v6 = vld [vmem:[%s2595_s0 + $0x80] sm:$0xf] }
  0x1e   :  { %1795 = vmatpush3.bf16.msra.mxu1 %v1929_v29  ;;  %v205_v28 = vrot.slane %v204_v18, 4  ;;  %v214_v29 = vrot.slane %v212_v19, 4  ;;  %v223_v31 = vrot.slane %v221_v21, 5  ;;  %v228_v35 = vrot.slane %v226_v24, 4  ;;  %v67_v14 = vld [vmem:[%s2595_s0 + $0x84] sm:$0x1] }
  0x1f   :  { %1796 = vmatprep.subr.bf16.mxu1 %v1933_v63  ;;  %1779 = vmatmul.mubr.msk.bf16.gmra.mrb[4].mxu1 %vm351_vm0, %v1560_v5  ;;  %v196_v32 = vsel %vm2068_vm3, %v191_v22, %v195_v2  ;;  %v231_v36 = vrot.slane %v229_v25, 5  ;;  %v237_v37 = vrot.slane %v235_v27, 5  ;;  %v240_v48 = vshrl.u32 %v2223_v43, 16  ;;  %v1932_v2 = vld [vmem:[%s2595_s0 + $0x70] ss:$8 sps:$4 sm:$0xff]  }
  0x20   :  { %1845 = vmatpush3.bf16.msra.mxu0 %v1935_v4  ;;  %v210_v38 = vsel %vm2068_vm3, %v205_v28, %v209_v7  ;;  %v218_v39 = vor.u32 %v217_v30, %v214_v29  ;;  %v243_v50 = vshll.u32 %v2223_v43, 16  ;;  %v249_v51 = vshll.u32 %v64_v44, 16  ;;  %v2252_v5 = vld [vmem:[%s2595_s0 + $0x78] sm:$0xf]  ;;  %v66_v7 = vld [vmem:[%s2595_s0 + $0x7c] sm:$0x1] }
  0x21   :  { %v1561_v41 = vcombine.low %v196_v32, %v210_v38  ;;  %v232_v42 = vor.u32 %v231_v36, %v228_v35  ;;  %v254_v55 = vshrl.u32 %v2228_v33, 16  ;;  %v257_v56 = vshll.u32 %v2228_v33, 16  ;;  %v1934_v38 = vld [vmem:[%s2595_s0 + $0x80] ss:$8 sps:$4 sm:$0xff]  }
  0x22   :  { %1797 = vmatpush3.bf16.msra.mxu1 %v1933_v63  ;;  %v219_v45 = vrot.slane %v218_v39, 4  ;;  %v263_v57 = vshll.u32 %v65_v47, 16  ;;  %v242_v59 = vrot.slane %v240_v48, 4  ;;  %v245_v60 = vrot.slane %v243_v50, 5  ;;  %v1633_v44 = vld [vmem:[%s2595_s0 + $0x8] sm:$0xf] }
  0x23   :  { %1831 = vmatmul.mubr.msk.bf16.gmra.mrb[8].mxu0 %vm351_vm0, %v1930_v40  ;;  %1782 = vmatprep.mubr.msk.bf16.mxu1 %vm351_vm0, %v1561_v41  ;;  %v233_v52 = vrot.slane %v232_v42, 4  ;;  %v251_v61 = vrot.slane %v249_v51, 5  ;;  %v256_v63 = vrot.slane %v254_v55, 4  ;;  %v259_v0 = vrot.slane %v257_v56, 5  ;;  %v1635_v51 = vld [vmem:[%s2595_s0 + $0x10] sm:$0xf] }
  0x24   :  { %v224_v58 = vsel %vm2068_vm3, %v219_v45, %v223_v31  ;;  %v265_v1 = vrot.slane %v263_v57, 5  ;;  %v246_v4 = vor.u32 %v245_v60, %v242_v59  ;;  %v1577_v10 = vcombine.low %v2022_v8, %v2027_v9  ;;  %1834 = vmatprep.mubr.msk.bf16.mxu0 %vm351_vm0, %v1932_v2  ;;  %v1634_v45 = vld [vmem:[%s2595_s0 + $0xc] sm:$0x1]  ;;  %v1644_v8 = vld [vmem:[%s2595_s0 + $0x34] sm:$0x1] }
  0x25   :  { %v238_v62 = vsel %vm2068_vm3, %v233_v52, %v237_v37  ;;  %v260_v12 = vor.u32 %v259_v0, %v256_v63  ;;  %v268_v15 = vshrl.u32 %v2252_v5, 16  ;;  %v271_v18 = vshll.u32 %v2252_v5, 16  ;;  %v1636_v52 = vld [vmem:[%s2595_s0 + $0x14] sm:$0x1] }
  0x26   :  { %v1562_v3 = vcombine.low %v224_v58, %v238_v62  ;;  %v277_v19 = vshll.u32 %v66_v7, 16  ;;  %v247_v20 = vrot.slane %v246_v4, 4  ;;  %v282_v21 = vshrl.u32 %v2257_v6, 16  ;;  %v1637_v62 = vld [vmem:[%s2595_s0 + $0x18] sm:$0xf] }
  0x27   :  { %v285_v22 = vshll.u32 %v2257_v6, 16  ;;  %v291_v24 = vshll.u32 %v67_v14, 16  ;;  %v261_v25 = vrot.slane %v260_v12, 4  ;;  %v270_v27 = vrot.slane %v268_v15, 4  ;;  %v1639_v15 = vld [vmem:[%s2595_s0 + $0x20] sm:$0xf] }
  0x28   :  { %1783 = vmatmul.mubr.msk.bf16.gmra.mrb[8].mxu1 %vm351_vm0, %v1562_v3  ;;  %v273_v28 = vrot.slane %v271_v18, 5  ;;  %v279_v29 = vrot.slane %v277_v19, 5  ;;  %v252_v30 = vsel %vm2068_vm3, %v247_v20, %v251_v61  ;;  %v284_v31 = vrot.slane %v282_v21, 4  ;;  %v1638_v3 = vld [vmem:[%s2595_s0 + $0x1c] sm:$0x1] }
  0x29   :  { %v287_v32 = vrot.slane %v285_v22, 5  ;;  %v293_v35 = vrot.slane %v291_v24, 5  ;;  %v266_v36 = vsel %vm2068_vm3, %v261_v25, %v265_v1  ;;  %v1578_v39 = vcombine.low %v2045_v23, %v2051_v26  ;;  %v1640_v21 = vld [vmem:[%s2595_s0 + $0x24] sm:$0x1] }
  0x2a   :  { %v274_v37 = vor.u32 %v273_v28, %v270_v27  ;;  %v1579_v40 = vcombine.low %v2088_v53, %v2093_v54  ;;  %v1563_v41 = vcombine.low %v252_v30, %v266_v36  ;;  %v1580_v47 = vcombine.low %v2123_v16, %v2128_v17  ;;  %v1642_v36 = vld [vmem:[%s2595_s0 + $0x2c] sm:$0x1]  ;;  %v1651_v54 = vld [vmem:[%s2595_s0 + $0x58] sm:$0xf] }
  0x2b   :  { %v288_v42 = vor.u32 %v287_v32, %v284_v31  ;;  %v1581_v48 = vcombine.low %v2159_v46, %v2165_v49  ;;  %1835 = vmatmul.mubr.msk.bf16.gmra.mrb[12].mxu0 %vm351_vm0, %v1934_v38  ;;  %v920_v55 = vshrl.u32 %v1633_v44, 16  ;;  %v1582_v56 = vcombine.low %v2194_v11, %v2199_v13 }
  0x2c   :  { %v275_v50 = vrot.slane %v274_v37, 4  ;;  %v1583_v57 = vcombine.low %v2223_v43, %v2228_v33  ;;  %1786 = vmatprep.mubr.msk.bf16.mxu1 %vm351_vm0, %v1563_v41  ;;  %v923_v59 = vshll.u32 %v1633_v44, 16  ;;  %v929_v60 = vshll.u32 %v1634_v45, 16  ;;  %v1643_v44 = vld [vmem:[%s2595_s0 + $0x30] sm:$0xf] }
  0x2d   :  { %v289_v58 = vrot.slane %v288_v42, 4  ;;  %v934_v61 = vshrl.u32 %v1635_v51, 16  ;;  %v922_v0 = vrot.slane %v920_v55, 4  ;;  %v937_v1 = vshll.u32 %v1635_v51, 16 }
  0x2e   :  { %v280_v63 = vsel %vm2068_vm3, %v275_v50, %v279_v29  ;;  %v943_v2 = vshll.u32 %v1636_v52, 16  ;;  %v925_v7 = vrot.slane %v923_v59, 5  ;;  %v931_v12 = vrot.slane %v929_v60, 5  ;;  %v1641_v29 = vld [vmem:[%s2595_s0 + $0x28] sm:$0xf] }
  0x2f   :  { %v294_v4 = vsel %vm2068_vm3, %v289_v58, %v293_v35  ;;  %v936_v14 = vrot.slane %v934_v61, 4  ;;  %v939_v19 = vrot.slane %v937_v1, 5  ;;  %v948_v22 = vshrl.u32 %v1637_v62, 16 }
  0x30   :  { %v1564_v18 = vcombine.low %v280_v63, %v294_v4  ;;  %v945_v20 = vrot.slane %v943_v2, 5  ;;  %v926_v24 = vor.u32 %v925_v7, %v922_v0  ;;  %v951_v25 = vshll.u32 %v1637_v62, 16  ;;  %v1645_v63 = vld [vmem:[%s2595_s0 + $0x38] sm:$0xf]  ;;  %v1646_v4 = vld [vmem:[%s2595_s0 + $0x3c] sm:$0x1] }
  0x31   :  { %v957_v27 = vshll.u32 %v1638_v3, 16  ;;  %v962_v28 = vshrl.u32 %v1639_v15, 16  ;;  %v940_v30 = vor.u32 %v939_v19, %v936_v14  ;;  %v950_v31 = vrot.slane %v948_v22, 4 }
  0x32   :  { %1787 = vmatmul.mubr.msk.bf16.gmra.mrb[12].mxu1 %vm351_vm0, %v1564_v18  ;;  %v965_v32 = vshll.u32 %v1639_v15, 16  ;;  %v971_v35 = vshll.u32 %v1640_v21, 16  ;;  %v927_v37 = vrot.slane %v926_v24, 4  ;;  %v953_v38 = vrot.slane %v951_v25, 5  ;;  %v1648_v21 = vld [vmem:[%s2595_s0 + $0x44] sm:$0x1] }
  0x33   :  { %1798 = vmatprep.mubr.msk.bf16.mxu1 %vm351_vm0, %v1577_v10  ;;  %v959_v41 = vrot.slane %v957_v27, 5  ;;  %v964_v42 = vrot.slane %v962_v28, 4  ;;  %v941_v45 = vrot.slane %v940_v30, 4  ;;  %v976_v52 = vshrl.u32 %v1641_v29, 16  ;;  %v1649_v30 = vld [vmem:[%s2595_s0 + $0x50] sm:$0xf] }
  0x34   :  { %v967_v50 = vrot.slane %v965_v32, 5  ;;  %v973_v51 = vrot.slane %v971_v35, 5  ;;  %v932_v55 = vsel %vm2068_vm3, %v927_v37, %v931_v12  ;;  %v954_v58 = vor.u32 %v953_v38, %v950_v31  ;;  %v1650_v38 = vld [vmem:[%s2595_s0 + $0x54] sm:$0x1] }
  0x35   :  { %v979_v9 = vshll.u32 %v1641_v29, 16  ;;  %v985_v10 = vshll.u32 %v1642_v36, 16  ;;  %v946_v59 = vsel %vm2068_vm3, %v941_v45, %v945_v20  ;;  %v978_v61 = vrot.slane %v976_v52, 4  ;;  %v1647_v20 = vld [vmem:[%s2595_s0 + $0x40] sm:$0xf] }
  0x36   :  { %v968_v60 = vor.u32 %v967_v50, %v964_v42  ;;  %v990_v62 = vshrl.u32 %v1643_v44, 16  ;;  %v1665_v0 = vcombine.low %v932_v55, %v946_v59  ;;  %v955_v1 = vrot.slane %v954_v58, 4  ;;  %v1652_v58 = vld [vmem:[%s2595_s0 + $0x5c] sm:$0x1] }
  0x37   :  { %v981_v2 = vrot.slane %v979_v9, 5  ;;  %v987_v3 = vrot.slane %v985_v10, 5  ;;  %v993_v14 = vshll.u32 %v1643_v44, 16  ;;  %v999_v15 = vshll.u32 %v1644_v8, 16 }
  0x38   :  { %v969_v7 = vrot.slane %v968_v60, 4  ;;  %v992_v12 = vrot.slane %v990_v62, 4  ;;  %1846 = vmatprep.mubr.msk.bf16.mxu0 %vm351_vm0, %v1665_v0  ;;  %v960_v18 = vsel %vm2068_vm3, %v955_v1, %v959_v41  ;;  %v1004_v22 = vshrl.u32 %v1645_v63, 16  ;;  %v1653_v62 = vld [vmem:[%s2595_s0 + $0x60] sm:$0xf] }
  0x39   :  { %v982_v19 = vor.u32 %v981_v2, %v978_v61  ;;  %v1007_v24 = vshll.u32 %v1645_v63, 16  ;;  %v995_v27 = vrot.slane %v993_v14, 5  ;;  %v1001_v28 = vrot.slane %v999_v15, 5  ;;  %v1654_v63 = vld [vmem:[%s2595_s0 + $0x64] sm:$0x1] }
  0x3a   :  { %1799 = vmatmul.mubr.msk.bf16.vlgmr.msra.gmra.mrb[0].mxu1 %vm351_vm0, %v1578_v39  ;;  %v974_v25 = vsel %vm2068_vm3, %v969_v7, %v973_v51  ;;  %v1013_v29 = vshll.u32 %v1646_v4, 16  ;;  %v1006_v23 = vrot.slane %v1004_v22, 4  ;;  %v1018_v36 = vshrl.u32 %v1647_v20, 16  ;;  %v1655_v4 = vld [vmem:[%s2595_s0 + $0x68] sm:$0xf] }
  0x3b   :  { %v1666_v31 = vcombine.low %v960_v18, %v974_v25  ;;  %1802 = vmatprep.mubr.msk.bf16.mxu1 %vm351_vm0, %v1579_v40  ;;  %v983_v32 = vrot.slane %v982_v19, 4  ;;  %v1009_v26 = vrot.slane %v1007_v24, 5  ;;  %v996_v39 = vor.u32 %v995_v27, %v992_v12  ;;  %v1656_v18 = vld [vmem:[%s2595_s0 + $0x6c] sm:$0x1] }
  0x3c   :  { %v1015_v35 = vrot.slane %v1013_v29, 5  ;;  %v1021_v37 = vshll.u32 %v1647_v20, 16  ;;  %v1027_v53 = vshll.u32 %v1648_v21, 16  ;;  %v1032_v40 = vshrl.u32 %v1649_v30, 16 }
  0x3d   :  { %1847 = vmatmul.mubr.msk.bf16.vlgmr.msra.gmra.mrb[0].mxu0 %vm351_vm0, %v1666_v31  ;;  %v988_v41 = vsel %vm2068_vm3, %v983_v32, %v987_v3  ;;  %v1010_v42 = vor.u32 %v1009_v26, %v1006_v23  ;;  %v997_v44 = vrot.slane %v996_v39, 4  ;;  %v1020_v45 = vrot.slane %v1018_v36, 4 }
  0x3e   :  { %v1023_v50 = vrot.slane %v1021_v37, 5  ;;  %v1035_v51 = vshll.u32 %v1649_v30, 16  ;;  %v1029_v55 = vrot.slane %v1027_v53, 5  ;;  %v1034_v8 = vrot.slane %v1032_v40, 4 }
  0x3f   :  { %v1011_v52 = vrot.slane %v1010_v42, 4  ;;  %v1041_v9 = vshll.u32 %v1650_v38, 16  ;;  %v1002_v10 = vsel %vm2068_vm3, %v997_v44, %v1001_v28  ;;  %v1046_v61 = vshrl.u32 %v1651_v54, 16 }
  0x40   :  { %v1024_v59 = vor.u32 %v1023_v50, %v1020_v45  ;;  %v1037_v60 = vrot.slane %v1035_v51, 5  ;;  %v1667_v0 = vcombine.low %v988_v41, %v1002_v10  ;;  %v1049_v3 = vshll.u32 %v1651_v54, 16 }
  0x41   :  { %v1016_v1 = vsel %vm2068_vm3, %v1011_v52, %v1015_v35  ;;  %v1043_v2 = vrot.slane %v1041_v9, 5  ;;  %v1048_v14 = vrot.slane %v1046_v61, 4  ;;  %v1055_v15 = vshll.u32 %v1652_v58, 16 }
  0x42   :  { %1803 = vmatmul.mubr.msk.bf16.gmra.mrb[4].mxu1 %vm351_vm0, %v1580_v47  ;;  %v1025_v7 = vrot.slane %v1024_v59, 4  ;;  %v1038_v12 = vor.u32 %v1037_v60, %v1034_v8  ;;  %1850 = vmatprep.mubr.msk.bf16.mxu0 %vm351_vm0, %v1667_v0  ;;  %v1051_v19 = vrot.slane %v1049_v3, 5  ;;  %v1060_v20 = vshrl.u32 %v1653_v62, 16 }
  0x43   :  { %1806 = vmatprep.mubr.msk.bf16.mxu1 %vm351_vm0, %v1581_v48  ;;  %v1063_v16 = vshll.u32 %v1653_v62, 16  ;;  %v1069_v17 = vshll.u32 %v1654_v63, 16 }
  0x44   :  { %10 = vsyncpa [#allocation3], 0  ;;  %v1030_v47 = vsel %vm2068_vm3, %v1025_v7, %v1029_v55  ;;  %v1039_v21 = vrot.slane %v1038_v12, 4  ;;  %v1057_v22 = vrot.slane %v1055_v15, 5  ;;  %v1074_v24 = vshrl.u32 %v1655_v4, 16 }
  0x45   :  { %v1657_v25 = vld [vmem:[%s2595_s0 + $0x70] sm:$0xf]  ;;  %v1668_v27 = vcombine.low %v1016_v1, %v1030_v47  ;;  %v1052_v28 = vor.u32 %v1051_v19, %v1048_v14  ;;  %v1062_v46 = vrot.slane %v1060_v20, 4  ;;  %v1065_v49 = vrot.slane %v1063_v16, 5  ;;  %v1659_v48 = vld [vmem:[%s2595_s0 + $0x78] sm:$0xf] }
  0x46   :  { %v1044_v29 = vsel %vm2068_vm3, %v1039_v21, %v1043_v2  ;;  %v1071_v30 = vrot.slane %v1069_v17, 5  ;;  %v1076_v31 = vrot.slane %v1074_v24, 4  ;;  %v1077_v32 = vshll.u32 %v1655_v4, 16  ;;  %v1658_v23 = vld [vmem:[%s2595_s0 + $0x74] sm:$0x1] }
  0x47   :  { %1851 = vmatmul.mubr.msk.bf16.gmra.mrb[4].mxu0 %vm351_vm0, %v1668_v27  ;;  %v1053_v26 = vrot.slane %v1052_v28, 4  ;;  %v1066_v39 = vor.u32 %v1065_v49, %v1062_v46  ;;  %v1083_v35 = vshll.u32 %v1656_v18, 16  ;;  %v1088_v36 = vshrl.u32 %v1657_v25, 16  ;;  %v1660_v38 = vld [vmem:[%s2595_s0 + $0x7c] sm:$0x1] }
  0x48   :  { %v1079_v37 = vrot.slane %v1077_v32, 5  ;;  %v1091_v41 = vshll.u32 %v1657_v25, 16  ;;  %v1102_v42 = vshrl.u32 %v1659_v48, 16  ;;  %v1584_v53 = vcombine.low %v2252_v5, %v2257_v6  ;;  %v1661_v50 = vld [vmem:[%s2595_s0 + $0x80] sm:$0xf] }
  0x49   :  { %v1058_v54 = vsel %vm2068_vm3, %v1053_v26, %v1057_v22  ;;  %v1067_v40 = vrot.slane %v1066_v39, 4  ;;  %v1090_v44 = vrot.slane %v1088_v36, 4  ;;  %v1097_v45 = vshll.u32 %v1658_v23, 16  ;;  %v1662_v5 = vld [vmem:[%s2595_s0 + $0x84] sm:$0x1] }
  0x4a   :  { %v1669_v51 = vcombine.low %v1044_v29, %v1058_v54  ;;  %1807 = vmatmul.mubr.msk.bf16.gmra.mrb[8].mxu1 %vm351_vm0, %v1582_v56  ;;  %v1080_v52 = vor.u32 %v1079_v37, %v1076_v31  ;;  %v1085_v55 = vrot.slane %v1083_v35, 5  ;;  %v1093_v58 = vrot.slane %v1091_v41, 5  ;;  %v1663_v6 = vld [vmem:[%s2595_s0 + $0x88] sm:$0xf]  ;;  %v1664_v63 = vld [vmem:[%s2595_s0 + $0x8c] sm:$0x1] }
  0x4b   :  { %v1072_v8 = vsel %vm2068_vm3, %v1067_v40, %v1071_v30  ;;  %1810 = vmatprep.mubr.msk.bf16.mxu1 %vm351_vm0, %v1583_v57  ;;  %v1104_v11 = vrot.slane %v1102_v42, 4  ;;  %v1105_v13 = vshll.u32 %v1659_v48, 16  ;;  %v1111_v56 = vshll.u32 %v1660_v38, 16  ;;  %v2469_v23 = vld [vmem:[%s2597_s2] ss:$0 sm:$0xff] }
  0x4c   :  { %1854 = vmatprep.mubr.msk.bf16.mxu0 %vm351_vm0, %v1669_v51  ;;  %v1081_v9 = vrot.slane %v1080_v52, 4  ;;  %v1094_v10 = vor.u32 %v1093_v58, %v1090_v44  ;;  %v1116_v59 = vshrl.u32 %v1661_v50, 16  ;;  %v1119_v60 = vshll.u32 %v1661_v50, 16 }
  0x4d   :  { %v1099_v61 = vrot.slane %v1097_v45, 5  ;;  %v1107_v62 = vrot.slane %v1105_v13, 5  ;;  %v1125_v0 = vshll.u32 %v1662_v5, 16  ;;  %v1130_v1 = vshrl.u32 %v1663_v6, 16 }
  0x4e   :  { %v1086_v43 = vsel %vm2068_vm3, %v1081_v9, %v1085_v55  ;;  %v1095_v33 = vrot.slane %v1094_v10, 4  ;;  %v1118_v57 = vrot.slane %v1116_v59, 4  ;;  %v1121_v2 = vrot.slane %v1119_v60, 5 }
  0x4f   :  { %v1670_v3 = vcombine.low %v1072_v8, %v1086_v43  ;;  %v1108_v4 = vor.u32 %v1107_v62, %v1104_v11  ;;  %v1113_v7 = vrot.slane %v1111_v56, 5  ;;  %v1132_v14 = vrot.slane %v1130_v1, 4 }
  0x50   :  { %v1122_v12 = vor.u32 %v1121_v2, %v1118_v57  ;;  %v1133_v15 = vshll.u32 %v1663_v6, 16  ;;  %v1139_v18 = vshll.u32 %v1664_v63, 16  ;;  %v1100_v19 = vsel %vm2068_vm3, %v1095_v33, %v1099_v61 }
  0x51   :  { %1855 = vmatmul.mubr.msk.bf16.gmra.mrb[8].mxu0 %vm351_vm0, %v1670_v3  ;;  %v1109_v20 = vrot.slane %v1108_v4, 4  ;;  %v1127_v17 = vrot.slane %v1125_v0, 5  ;;  %vm22_vm4 = vcmask 123904   ;;  %v1968_v48 = vmov 0.0  }
  0x52   :  { %1811 = vmatmul.mubr.msk.bf16.gmra.mrb[12].mxu1 %vm351_vm0, %v1584_v53  ;;  %v1123_v16 = vrot.slane %v1122_v12, 4  ;;  %v1135_v47 = vrot.slane %v1133_v15, 5  ;;  %v1141_v25 = vrot.slane %v1139_v18, 5  ;;  %23 = vst.msk [vmem:[#allocation2] sm:$0x3] %vm22_vm4, %v1968_v48  ;;  %vm1521_vm5 = vcmask 125952  }
  0x53   :  { %v1114_v21 = vsel %vm2068_vm3, %v1109_v20, %v1113_v7  ;;  %vm1360_vm6 = vcmask 130048   ;;  %vm1399_vm7 = vcmask 122880  }
  0x54   :  { %v1671_v22 = vcombine.low %v1100_v19, %v1114_v21  ;;  %v1136_v24 = vor.u32 %v1135_v47, %v1132_v14  ;;  %v1128_v27 = vsel %vm2068_vm3, %v1123_v16, %v1127_v17 }
  0x56   :  { %1858 = vmatprep.mubr.msk.bf16.mxu0 %vm351_vm0, %v1671_v22  ;;  %v1137_v28 = vrot.slane %v1136_v24, 4 }
  0x58   :  { %v1142_v46 = vsel %vm2068_vm3, %v1137_v28, %v1141_v25 }
  0x59   :  { %v1672_v49 = vcombine.low %v1128_v27, %v1142_v46 }
  0x5b   :  { %1859 = vmatmul.mubr.msk.bf16.gmra.mrb[12].mxu0 %vm351_vm0, %v1672_v49 }
 0x10d   :  { %v1800_v29 = vpop.f32.mrb[0].mxu1 }
 0x10e   :  { %v595_v30 = vpop.f32.mrb[1].mxu1 }
 0x10f   :  { %v1801_v31 = vpop.f32.mrb[2].mxu1 }
 0x110   :  { %v1848_v32 = vpop.f32.mrb[0].mxu0  ;;  %v598_v26 = vpop.f32.mrb[3].mxu1 }
 0x111   :  { %v1862_v39 = vadd.f32 %v1848_v32, %v1800_v29  ;;  %v1257_v35 = vpop.f32.mrb[1].mxu0 }
 0x112   :  { %v1863_v34 = vadd.f32 %v1257_v35, %v595_v30  ;;  %v1849_v36 = vpop.f32.mrb[2].mxu0 }
 0x113   :  { %v1345_v37 = vadd.f32 %v1862_v39, %v2469_v23  ;;  %v1864_v38 = vadd.f32 %v1849_v36, %v1801_v31  ;;  %v1260_v41 = vpop.f32.mrb[3].mxu0 }
 0x114   :  { %v1343_v42 = vadd.f32 %v1863_v34, %v2469_v23  ;;  %v1865_v53 = vadd.f32 %v1260_v41, %v598_v26 }
 0x115   :  { %v1704_v54 = vpack.c.bf16 %v1345_v37, %v1345_v37  ;;  %v1346_v40 = vadd.f32 %v1864_v38, %v2469_v23  ;;  %v1804_v44 = vpop.f32.mrb[4].mxu1  ;;  %v1404_v55 = vmul.f32 %v1345_v37, %v1345_v37  ;;  %v1364_v10 = vsel %vm1360_vm6, %v1345_v37, 0.0 }
 0x116   :  { %v1402_v45 = vmul.f32 %v1343_v42, %v1343_v42  ;;  %v1702_v50 = vpack.c.bf16 %v1343_v42, %v1343_v42  ;;  %v1344_v51 = vadd.f32 %v1865_v53, %v2469_v23  ;;  %v611_v52 = vpop.f32.mrb[5].mxu1  ;;  %v1361_v6 = vsel %vm1360_vm6, %v1343_v42, 0.0 }
 0x117   :  { %1524 = vst.msk [vmem:[%s2598_s3 + $0x8] sm:$0xf] %vm1521_vm5, %v1704_v54  ;;  %v1705_v58 = vpack.c.bf16 %v1346_v40, %v1346_v40  ;;  %v1805_v5 = vpop.f32.mrb[6].mxu1  ;;  %v1405_v60 = vmul.f32 %v1346_v40, %v1346_v40  ;;  %v1421_v33 = vsel %vm1360_vm6, %v1404_v55, 0.0  ;;  %v1366_v57 = vsel %vm1360_vm6, %v1346_v40, 0.0 }
 0x118   :  { %1522 = vst.msk [vmem:[%s2598_s3] sm:$0xf] %vm1521_vm5, %v1702_v50  ;;  %v1362_v8 = vsel %vm1360_vm6, %v1344_v51, 0.0  ;;  %v1403_v11 = vmul.f32 %v1344_v51, %v1344_v51  ;;  %v1703_v13 = vpack.c.bf16 %v1344_v51, %v1344_v51  ;;  %v614_v56 = vpop.f32.mrb[7].mxu1  ;;  %v1418_v59 = vsel %vm1360_vm6, %v1402_v45, 0.0 }
 0x119   :  { %1525 = vst.msk [vmem:[%s2598_s3 + $0xc] sm:$0xf] %vm1521_vm5, %v1705_v58  ;;  %v1363_v9 = vadd.f32 %v1362_v8, %v1361_v6  ;;  %v1423_v19 = vsel %vm1360_vm6, %v1405_v60, 0.0 }
 0x11a   :  { %v1419_v61 = vsel %vm1360_vm6, %v1403_v11, 0.0  ;;  %1523 = vst.msk [vmem:[%s2598_s3 + $0x4] sm:$0xf] %vm1521_vm5, %v1703_v13  ;;  %v1852_v62 = vpop.f32.mrb[4].mxu0 }
 0x11b   :  { %v1365_v63 = vadd.f32 %v1364_v10, %v1363_v9  ;;  %v1420_v0 = vadd.f32 %v1419_v61, %v1418_v59  ;;  %v1866_v1 = vadd.f32 %v1852_v62, %v1804_v44  ;;  %v1273_v43 = vpop.f32.mrb[5].mxu0 }
 0x11c   :  { %v1867_v2 = vadd.f32 %v1273_v43, %v611_v52  ;;  %v1853_v3 = vpop.f32.mrb[6].mxu0 }
 0x11d   :  { %v1422_v4 = vadd.f32 %v1421_v33, %v1420_v0  ;;  %v1349_v7 = vadd.f32 %v1866_v1, %v2469_v23  ;;  %v1367_v12 = vadd.f32 %v1366_v57, %v1365_v63  ;;  %v1868_v14 = vadd.f32 %v1853_v3, %v1805_v5  ;;  %v1276_v15 = vpop.f32.mrb[7].mxu0  ;;  %v1808_v18 = vpop.f32.mrb[8].mxu1 }
 0x11e   :  { %v1347_v20 = vadd.f32 %v1867_v2, %v2469_v23  ;;  %v1869_v16 = vadd.f32 %v1276_v15, %v614_v56  ;;  %v627_v17 = vpop.f32.mrb[9].mxu1 }
 0x11f   :  { %v1708_v47 = vpack.c.bf16 %v1349_v7, %v1349_v7  ;;  %v1424_v21 = vadd.f32 %v1423_v19, %v1422_v4  ;;  %v1809_v22 = vpop.f32.mrb[10].mxu1  ;;  %v1350_v28 = vadd.f32 %v1868_v14, %v2469_v23  ;;  %v1408_v29 = vmul.f32 %v1349_v7, %v1349_v7 }
 0x120   :  { %v1368_v24 = vsel %vm1360_vm6, %v1347_v20, 0.0  ;;  %v1406_v25 = vmul.f32 %v1347_v20, %v1347_v20  ;;  %v1706_v27 = vpack.c.bf16 %v1347_v20, %v1347_v20  ;;  %v630_v46 = vpop.f32.mrb[11].mxu1  ;;  %v1348_v48 = vadd.f32 %v1869_v16, %v2469_v23 }
 0x121   :  { %1528 = vst.msk [vmem:[%s2598_s3 + $0x18] sm:$0xf] %vm1521_vm5, %v1708_v47  ;;  %v1369_v49 = vadd.f32 %v1368_v24, %v1367_v12  ;;  %v1709_v31 = vpack.c.bf16 %v1350_v28, %v1350_v28  ;;  %v1372_v37 = vsel %vm1360_vm6, %v1349_v7, 0.0  ;;  %v1409_v38 = vmul.f32 %v1350_v28, %v1350_v28 }
 0x122   :  { %v1425_v30 = vsel %vm1360_vm6, %v1406_v25, 0.0  ;;  %1526 = vst.msk [vmem:[%s2598_s3 + $0x10] sm:$0xf] %vm1521_vm5, %v1706_v27  ;;  %v1370_v26 = vsel %vm1360_vm6, %v1348_v48, 0.0  ;;  %v1407_v39 = vmul.f32 %v1348_v48, %v1348_v48  ;;  %v1707_v35 = vpack.c.bf16 %v1348_v48, %v1348_v48 }
 0x123   :  { %v1426_v32 = vadd.f32 %v1425_v30, %v1424_v21  ;;  %1529 = vst.msk [vmem:[%s2598_s3 + $0x1c] sm:$0xf] %vm1521_vm5, %v1709_v31  ;;  %v1371_v34 = vadd.f32 %v1370_v26, %v1369_v49  ;;  %v1429_v52 = vsel %vm1360_vm6, %v1408_v29, 0.0  ;;  %v1374_v55 = vsel %vm1360_vm6, %v1350_v28, 0.0 }
 0x124   :  { %v1856_v36 = vpop.f32.mrb[8].mxu0  ;;  %v1427_v41 = vsel %vm1360_vm6, %v1407_v39, 0.0  ;;  %1527 = vst.msk [vmem:[%s2598_s3 + $0x14] sm:$0xf] %vm1521_vm5, %v1707_v35  ;;  %v1431_v59 = vsel %vm1360_vm6, %v1409_v38, 0.0 }
 0x125   :  { %v1870_v42 = vadd.f32 %v1856_v36, %v1808_v18  ;;  %v1289_v53 = vpop.f32.mrb[9].mxu0  ;;  %v1812_v54 = vpop.f32.mrb[12].mxu1  ;;  %v1373_v40 = vadd.f32 %v1372_v37, %v1371_v34  ;;  %v1428_v44 = vadd.f32 %v1427_v41, %v1426_v32 }
 0x126   :  { %v1871_v45 = vadd.f32 %v1289_v53, %v627_v17  ;;  %v1857_v50 = vpop.f32.mrb[10].mxu0  ;;  %v643_v51 = vpop.f32.mrb[13].mxu1 }
 0x127   :  { %v1353_v58 = vadd.f32 %v1870_v42, %v2469_v23  ;;  %v1872_v5 = vadd.f32 %v1857_v50, %v1809_v22  ;;  %v1292_v6 = vpop.f32.mrb[11].mxu0  ;;  %v1813_v8 = vpop.f32.mrb[14].mxu1  ;;  %v1430_v11 = vadd.f32 %v1429_v52, %v1428_v44  ;;  %v1375_v56 = vadd.f32 %v1374_v55, %v1373_v40 }
 0x128   :  { %v1351_v13 = vadd.f32 %v1871_v45, %v2469_v23  ;;  %v1873_v9 = vadd.f32 %v1292_v6, %v630_v46  ;;  %v646_v10 = vpop.f32.mrb[15].mxu1 }
 0x129   :  { %v1712_v60 = vpack.c.bf16 %v1353_v58, %v1353_v58  ;;  %v1354_v61 = vadd.f32 %v1872_v5, %v2469_v23  ;;  %v1432_v0 = vadd.f32 %v1431_v59, %v1430_v11  ;;  %v1412_v4 = vmul.f32 %v1353_v58, %v1353_v58 }
 0x12a   :  { %v1376_v62 = vsel %vm1360_vm6, %v1351_v13, 0.0  ;;  %v1410_v63 = vmul.f32 %v1351_v13, %v1351_v13  ;;  %v1710_v1 = vpack.c.bf16 %v1351_v13, %v1351_v13  ;;  %v1352_v2 = vadd.f32 %v1873_v9, %v2469_v23 }
 0x12b   :  { %1532 = vst.msk [vmem:[%s2598_s3 + $0x28] sm:$0xf] %vm1521_vm5, %v1712_v60  ;;  %v1377_v43 = vadd.f32 %v1376_v62, %v1375_v56  ;;  %v1713_v57 = vpack.c.bf16 %v1354_v61, %v1354_v61  ;;  %v1413_v18 = vmul.f32 %v1354_v61, %v1354_v61  ;;  %v1380_v17 = vsel %vm1360_vm6, %v1353_v58, 0.0 }
 0x12c   :  { %v1433_v33 = vsel %vm1360_vm6, %v1410_v63, 0.0  ;;  %1530 = vst.msk [vmem:[%s2598_s3 + $0x20] sm:$0xf] %vm1521_vm5, %v1710_v1  ;;  %v1378_v7 = vsel %vm1360_vm6, %v1352_v2, 0.0  ;;  %v1411_v12 = vmul.f32 %v1352_v2, %v1352_v2  ;;  %v1711_v14 = vpack.c.bf16 %v1352_v2, %v1352_v2 }
 0x12d   :  { %v1434_v3 = vadd.f32 %v1433_v33, %v1432_v0  ;;  %1533 = vst.msk [vmem:[%s2598_s3 + $0x2c] sm:$0xf] %vm1521_vm5, %v1713_v57  ;;  %v1379_v19 = vadd.f32 %v1378_v7, %v1377_v43  ;;  %v1437_v49 = vsel %vm1360_vm6, %v1412_v4, 0.0  ;;  %v1382_v30 = vsel %vm1360_vm6, %v1354_v61, 0.0  ;;  %v1359_v57 = vld [vmem:[#allocation2] sm:$0x1] }
 0x12e   :  { %v1860_v15 = vpop.f32.mrb[12].mxu0  ;;  %v1435_v47 = vsel %vm1360_vm6, %v1411_v12, 0.0  ;;  %1531 = vst.msk [vmem:[%s2598_s3 + $0x24] sm:$0xf] %vm1521_vm5, %v1711_v14  ;;  %v1439_v31 = vsel %vm1360_vm6, %v1413_v18, 0.0 }
 0x12f   :  { %v1874_v20 = vadd.f32 %v1860_v15, %v1812_v54  ;;  %v1305_v16 = vpop.f32.mrb[13].mxu0  ;;  %v1381_v24 = vadd.f32 %v1380_v17, %v1379_v19  ;;  %v1436_v25 = vadd.f32 %v1435_v47, %v1434_v3  ;;  %v1401_v4 = vld [vmem:[#allocation2 + $0x1] sm:$0x1] }
 0x130   :  { %v1875_v21 = vadd.f32 %v1305_v16, %v643_v51  ;;  %v1861_v22 = vpop.f32.mrb[14].mxu0 }
 0x131   :  { %v1357_v27 = vadd.f32 %v1874_v20, %v2469_v23  ;;  %v1876_v28 = vadd.f32 %v1861_v22, %v1813_v8  ;;  %v1308_v46 = vpop.f32.mrb[15].mxu0  ;;  %v1438_v32 = vadd.f32 %v1437_v49, %v1436_v25  ;;  %v1383_v39 = vadd.f32 %v1382_v30, %v1381_v24 }
 0x132   :  { %v1355_v48 = vadd.f32 %v1875_v21, %v2469_v23  ;;  %v1877_v29 = vadd.f32 %v1308_v46, %v646_v10 }
 0x133   :  { %v1716_v26 = vpack.c.bf16 %v1357_v27, %v1357_v27  ;;  %v1440_v37 = vadd.f32 %v1439_v31, %v1438_v32  ;;  %v1358_v38 = vadd.f32 %v1876_v28, %v2469_v23  ;;  %v1416_v44 = vmul.f32 %v1357_v27, %v1357_v27 }
 0x134   :  { %v1384_v35 = vsel %vm1360_vm6, %v1355_v48, 0.0  ;;  %v1414_v34 = vmul.f32 %v1355_v48, %v1355_v48  ;;  %v1714_v36 = vpack.c.bf16 %v1355_v48, %v1355_v48  ;;  %v1356_v41 = vadd.f32 %v1877_v29, %v2469_v23 }
 0x135   :  { %1536 = vst.msk [vmem:[%s2598_s3 + $0x38] sm:$0xf] %vm1521_vm5, %v1716_v26  ;;  %v1385_v42 = vadd.f32 %v1384_v35, %v1383_v39  ;;  %v1717_v40 = vpack.c.bf16 %v1358_v38, %v1358_v38  ;;  %v1388_v52 = vsel %vm1360_vm6, %v1357_v27, 0.0  ;;  %v1417_v55 = vmul.f32 %v1358_v38, %v1358_v38 }
 0x136   :  { %v1441_v53 = vsel %vm1360_vm6, %v1414_v34, 0.0  ;;  %1534 = vst.msk [vmem:[%s2598_s3 + $0x30] sm:$0xf] %vm1521_vm5, %v1714_v36  ;;  %v1386_v45 = vsel %vm1360_vm6, %v1356_v41, 0.0  ;;  %v1415_v50 = vmul.f32 %v1356_v41, %v1356_v41  ;;  %v1715_v51 = vpack.c.bf16 %v1356_v41, %v1356_v41 }
 0x137   :  { %v1442_v54 = vadd.f32 %v1441_v53, %v1440_v37  ;;  %1537 = vst.msk [vmem:[%s2598_s3 + $0x3c] sm:$0xf] %vm1521_vm5, %v1717_v40  ;;  %v1387_v23 = vadd.f32 %v1386_v45, %v1385_v42  ;;  %v1445_v8 = vsel %vm1360_vm6, %v1416_v44, 0.0  ;;  %v1390_v11 = vsel %vm1360_vm6, %v1358_v38, 0.0 }
 0x138   :  { %v1443_v58 = vsel %vm1360_vm6, %v1415_v50, 0.0  ;;  %1535 = vst.msk [vmem:[%s2598_s3 + $0x34] sm:$0xf] %vm1521_vm5, %v1715_v51  ;;  %v1447_v9 = vsel %vm1360_vm6, %v1417_v55, 0.0  ;;  %s1969_s3 = smov [#allocation2]  }
 0x139   :  { %v1389_v5 = vadd.f32 %v1388_v52, %v1387_v23  ;;  %v1444_v6 = vadd.f32 %v1443_v58, %v1442_v54  ;;  %s1546_s8 = sshll.u32 %s1969_s3, 4  ;;  %s1547_s8 = int_to_ptr.vmem [resolvable:$true] %s1546_s8 }
 0x13a   :  { %s1944_s9 = scalar_lea.vmem %s1547_s8, 32  ;;  %p1949_p1 = scmp.lt.s32.totalorder %s1547_s8, %s1547_s8 }
 0x13b   :  { %v1391_v13 = vadd.f32 %v1390_v11, %v1389_v5  ;;  %v1446_v56 = vadd.f32 %v1445_v8, %v1444_v6  ;;  %p1945_p0 = scmp.ne.s32.totalorder %s1547_s8, %s1944_s9  ;;  %p1950_p2 = scmp.lt.s32.totalorder %s1944_s9, %s1944_s9 }
 0x13d   :  { %v1392_v10 = vrot.slane %v1391_v13, 4  ;;  %v1448_v59 = vadd.f32 %v1447_v9, %v1446_v56  ;;  %p1951_p3 = por %p1950_p2, %p1949_p1 }
 0x13f   :  { %v1393_v60 = vadd.f32 %v1392_v10, %v1391_v13  ;;  %v1449_v61 = vrot.slane %v1448_v59, 4  ;;  %p1952_p4 = pnand %p1951_p3, %p1945_p0 }
 0x141   :  { %v1394_v62 = vrot.slane %v1393_v60, 2  ;;  %v1450_v63 = vadd.f32 %v1449_v61, %v1448_v59 }
 0x143   :  { %v1395_v0 = vadd.f32 %v1394_v62, %v1393_v60  ;;  %v1451_v1 = vrot.slane %v1450_v63, 2 }
 0x145   :  { %v1396_v43 = vrot.slane %v1395_v0, 1  ;;  %v1452_v33 = vadd.f32 %v1451_v1, %v1450_v63 }
 0x147   :  { %v1397_v2 = vadd.f32 %v1396_v43, %v1395_v0  ;;  %v1453_v3 = vrot.slane %v1452_v33, 1 }
 0x149   :  { %v1398_v7 = vadd.f32 %v1397_v2, %v1359_v57  ;;  %v1454_v12 = vadd.f32 %v1453_v3, %v1452_v33 }
 0x14b   :  { %1400 = vst.msk [vmem:[#allocation2] sm:$0x1] %vm1399_vm7, %v1398_v7  ;;  %v1455_v14 = vadd.f32 %v1454_v12, %v1401_v4 }
 0x14d   :  { %1456 = vst.msk [vmem:[#allocation2 + $0x1] sm:$0x1] %vm1399_vm7, %v1455_v14 }
 0x14e   :  { %1955 = shalt.err (!%p1952_p4)
}
 0x14f   :  { %s1956_s12 = scalar_lea.hbm %s2599_s4, 32 }
 0x150   :  { %p1957_p5 = scmp.ne.s32.totalorder %s2599_s4, %s1956_s12  ;;  %p1960_p6 = scmp.lt.u32.totalorder %s1956_s12, %s2599_s4 }
 0x152   :  { %p1962_p7 = pnand %p1960_p6, %p1957_p5 }
 0x154   :  { %1965 = shalt.err (!%p1962_p7)
}
 0x155   :  { %1549 = dma.vmem_to_hbm [thread:$0]  %s1547_s8, 32, %s2599_s4, [#allocation3]  }
 0x156   :  { %1966 = dma.done.wait [#allocation3], 32  }
 0x157   :  { %1967 = vsyncadd [#allocation3], 4294967264 }
 0x158   :  { %1555 = vsyncpa [#allocation3], 1 }

</bundles_post_ra>
